<compile_context>
chip_gen: v7x
topology: tpu7x:2x2x1
jax: 0.10.0
libtpu: 0.0.40
codegen_flags: <defaults>
</compile_context>

<pallas_src>
import functools

import jax
import jax.numpy as jnp
from jax.experimental import pallas as pl
from jax.experimental.pallas import tpu as pltpu

LANES = 128
_GROUP_ROWS = 512                            # in-kernel working-set granule
_SINGLE_SHOT_F32_BYTES = 4 * 1024 * 1024     # per input, f32-equivalent
_TILE_BYTES = 4 * 1024 * 1024                # native bytes per input per step
_VMEM_LIMIT = 32 * 1024 * 1024               # safe on v5e/v6e (128 MiB) & v7x (64 MiB)


def _tensorcores_per_chip():
    """2 on v7x (two TensorCores per chip), 1 on v5e/v6e and anything we fail
    to identify — the 1-chunk path is always correct and replay-free."""
    try:
        kind = jax.devices()[0].device_kind.lower()
    except Exception:
        return 1
    return 2 if ("v7" in kind or "7x" in kind) else 1


def _mse_single_kernel(o_ref, t_ref, out_ref):
    # Whole problem resident in VMEM: one DMA, VPU diff/square, one reduce.
    d = o_ref[...].astype(jnp.float32) - t_ref[...].astype(jnp.float32)
    out_ref[0, 0] = jnp.sum(d * d)


def _mse_tiled_kernel(o_ref, t_ref, out_ref, acc_ref, *, m_valid,
                      tiles_per_chunk, tile_rows, group_rows):
    i = pl.program_id(0)   # chunk (parallel; per-TensorCore on v7x)
    j = pl.program_id(1)   # tile within chunk (reduction axis, innermost)

    @pl.when(j == 0)
    def _():
        acc_ref[...] = jnp.zeros_like(acc_ref)

    row0 = (i * tiles_per_chunk + j) * tile_rows
    # Rows of this tile holding real data: 0 for fully-replayed clamp tiles,
    # < tile_rows only for the final partial tile.
    valid = jnp.clip(m_valid - row0, 0, tile_rows)
    n_full = valid // group_rows             # fully-valid row groups

    def accum_group(g, mask_limit):
        r = pl.multiple_of(g * group_rows, group_rows)
        og = o_ref[pl.ds(r, group_rows), :].astype(jnp.float32)
        tg = t_ref[pl.ds(r, group_rows), :].astype(jnp.float32)
        dd = og - tg
        dd = dd * dd
        if mask_limit is not None:
            rows = jax.lax.broadcasted_iota(jnp.int32, dd.shape, 0)
            dd = jnp.where(rows < mask_limit, dd, jnp.float32(0.0))
        # (G,128)->(G//8,8,128) keeps every (8,128) tile intact (free reshape);
        # the axis-0 sum is pure VPU vreg adds into the single-vreg accumulator.
        acc_ref[...] += jnp.sum(dd.reshape(group_rows // 8, 8, LANES), axis=0)

    # Steady state: unmasked accumulation (no iota / compare / select).
    def body(g, carry):
        accum_group(g, None)
        return carry

    jax.lax.fori_loop(0, n_full, body, 0)

    # At most one partial group at the end of the valid region gets a row mask;
    # groups past it (and whole replayed tiles) are skipped entirely.
    @pl.when(n_full * group_rows < valid)
    def _():
        accum_group(n_full, valid - n_full * group_rows)

    @pl.when(j == tiles_per_chunk - 1)
    def _():
        out_ref[0, 0] = jnp.sum(acc_ref[...])


def _mse_sum_single(o2d, t2d):
    return pl.pallas_call(
        _mse_single_kernel,
        out_shape=jax.ShapeDtypeStruct((1, 1), jnp.float32),
        in_specs=[pl.BlockSpec(memory_space=pltpu.VMEM),
                  pl.BlockSpec(memory_space=pltpu.VMEM)],
        out_specs=pl.BlockSpec(memory_space=pltpu.SMEM),
        compiler_params=pltpu.CompilerParams(vmem_limit_bytes=_VMEM_LIMIT),
    )(o2d, t2d)[0, 0]


def _mse_sum_tiled(o2d, t2d, m, row_bytes):
    # ~4 MiB of native dtype per input per grid step (f32: 8192 rows,
    # bf16: 16384 rows), rounded to a multiple of the in-kernel group size.
    tile_rows = max(_GROUP_ROWS,
                    (_TILE_BYTES // row_bytes) // _GROUP_ROWS * _GROUP_ROWS)
    num_blocks = pl.cdiv(m, tile_rows)

    # 2-way chunking only where it can pay off (v7x, enough tiles); on 1-TC
    # chips the grid is exact, so there is zero replayed-DMA waste.
    n_chunks = 2 if (_tensorcores_per_chip() >= 2 and num_blocks >= 8) else 1
    tiles_per_chunk = pl.cdiv(num_blocks, n_chunks)
    grid = (n_chunks, tiles_per_chunk)

    def in_map(i, j):
        # Clamp so the pipeline never DMAs past the array; a replayed tile sees
        # valid == 0 in-kernel and does no work.  With n_chunks == 1 the clamp
        # never binds.
        return (jnp.minimum(i * tiles_per_chunk + j, num_blocks - 1), 0)

    kernel = functools.partial(
        _mse_tiled_kernel, m_valid=m, tiles_per_chunk=tiles_per_chunk,
        tile_rows=tile_rows, group_rows=_GROUP_ROWS)

    # TODO(synk): verify on v7x that a plain 'parallel' leading axis actually
    # shards across the two TensorCores; switch to pltpu.CORE_PARALLEL if not.
    # Further knob (left out for safety): pipeline_mode=pl.Buffered(3) on the
    # input BlockSpecs once per-step DMA time shrinks on v7x.
    partials = pl.pallas_call(
        kernel,
        out_shape=jax.ShapeDtypeStruct((n_chunks, 1), jnp.float32),
        grid=grid,
        in_specs=[pl.BlockSpec((tile_rows, LANES), in_map),
                  pl.BlockSpec((tile_rows, LANES), in_map)],
        out_specs=pl.BlockSpec((1, 1), lambda i, j: (i, 0),
                               memory_space=pltpu.SMEM),
        scratch_shapes=[pltpu.VMEM((8, LANES), jnp.float32)],
        compiler_params=pltpu.CompilerParams(
            dimension_semantics=("parallel", "arbitrary"),
            vmem_limit_bytes=_VMEM_LIMIT),
    )(o2d, t2d)
    return jnp.sum(partials)


def mse_loss(outputs, targets):
    """mean((outputs - targets)**2) == nn.MSELoss()(outputs, targets)."""
    assert outputs.shape == targets.shape
    n = outputs.size
    assert n > 0

    # Row-major flatten of a contiguous array is a free bitcast; the upcast to
    # f32 happens in-kernel, after the native-dtype DMA.
    flat_o = outputs.reshape(-1)
    flat_t = targets.reshape(-1)

    inv_n = jnp.float32(1.0 / n)
    rem = n % LANES
    n_main = n - rem

    # Lane tail (< 128 elements) handled with a trivial host-side expression
    # instead of jnp.pad-ing full copies of both inputs through HBM.
    tail_sum = jnp.float32(0.0)
    if rem:
        to = flat_o[n_main:].astype(jnp.float32)
        tt = flat_t[n_main:].astype(jnp.float32)
        tail_sum = jnp.sum((to - tt) ** 2)
        if n_main:
            # TODO(synk): XLA may still materialize this prefix slice as a
            # copy; a fully copy-free ragged path needs lane-masked 1-D blocks,
            # which Mosaic lays out inefficiently (1-sublane vregs).
            flat_o = flat_o[:n_main]
            flat_t = flat_t[:n_main]

    if n_main == 0:   # degenerate: fewer than 128 elements, tail covers it all
        return tail_sum * inv_n

    m = n_main // LANES                    # lane-dense rows
    o2d = flat_o.reshape(m, LANES)
    t2d = flat_t.reshape(m, LANES)
    itemsize = max(o2d.dtype.itemsize, t2d.dtype.itemsize)

    # Single-shot if the f32-upcast working set stays ~4 MiB/input: one
    # contiguous DMA, no grid, no per-step pipeline overhead, and whole-array
    # intermediates stay far under every generation's scoped-VMEM budget.
    if m * LANES * 4 <= _SINGLE_SHOT_F32_BYTES:
        ksum = _mse_sum_single(o2d, t2d)
    else:
        ksum = _mse_sum_tiled(o2d, t2d, m, LANES * itemsize)

    return (ksum + tail_sum) * inv_n


if __name__ == "__main__":
    key = jax.random.PRNGKey(0)
    k1, k2, k3, k4, k5, k6 = jax.random.split(key, 6)

    # Primary case: NCHW (2, 4, 16, 16) f32 (2048 elems, lane-aligned) ->
    # copy-free single-shot path.
    outputs = jax.random.normal(k1, (2, 4, 16, 16), dtype=jnp.float32)
    targets = jax.random.normal(k2, (2, 4, 16, 16), dtype=jnp.float32)
    loss = mse_loss(outputs, targets)
    jax.block_until_ready(loss)
    ref = jnp.mean((outputs - targets) ** 2)
    assert jnp.allclose(loss, ref, rtol=1e-5, atol=1e-6), (loss, ref)

    # Ragged bf16 (n % 128 != 0): aligned prefix through the kernel, <128-elem
    # lane tail summed host-side (no jnp.pad of the full arrays).
    big_o = jax.random.normal(k3, (3, 7, 85, 167), dtype=jnp.bfloat16)
    big_t = jax.random.normal(k4, (3, 7, 85, 167), dtype=jnp.bfloat16)
    big_loss = mse_loss(big_o, big_t)
    jax.block_until_ready(big_loss)
    big_ref = jnp.mean(
        (big_o.astype(jnp.float32) - big_t.astype(jnp.float32)) ** 2)
    assert jnp.allclose(big_loss, big_ref, rtol=1e-4, atol=1e-5), (
        big_loss, big_ref)

    # Larger f32 (1.5M elems, lane-aligned, not tile-aligned): tiled path with
    # big dtype-aware tiles, single-vreg accumulator and a masked partial tile.
    huge_o = jax.random.normal(k5, (3, 4, 512, 250), dtype=jnp.float32)
    huge_t = jax.random.normal(k6, (3, 4, 512, 250), dtype=jnp.float32)
    huge_loss = mse_loss(huge_o, huge_t)
    jax.block_until_ready(huge_loss)
    huge_ref = jnp.mean((huge_o - huge_t) ** 2)
    assert jnp.allclose(huge_loss, huge_ref, rtol=1e-4, atol=1e-6), (
        huge_loss, huge_ref)

    print("KERNEL_OK")
</pallas_src>

<mosaic_0001>
module attributes {stable_mosaic.version = 11 : i64} {
  func.func @_mse_single_kernel(%arg0: memref<16x128xf32, #tpu.memory_space<vmem>>, %arg1: memref<16x128xf32, #tpu.memory_space<vmem>>, %arg2: memref<1x1xf32, #tpu.memory_space<smem>>) attributes {dimension_semantics = [], scalar_prefetch = 0 : i64, scratch_operands = 0 : i64, tpu.core_type = #tpu.core_type<tc>} {
    %c0 = arith.constant 0 : index
    %c0_0 = arith.constant 0 : index
    %0 = vector.load %arg0[%c0, %c0_0] : memref<16x128xf32, #tpu.memory_space<vmem>>, vector<16x128xf32>
    %c0_1 = arith.constant 0 : index
    %c0_2 = arith.constant 0 : index
    %1 = vector.load %arg1[%c0_1, %c0_2] : memref<16x128xf32, #tpu.memory_space<vmem>>, vector<16x128xf32>
    %2 = arith.subf %0, %1 : vector<16x128xf32>
    %3 = arith.mulf %2, %2 : vector<16x128xf32>
    %4 = vector.shape_cast %3 : vector<16x128xf32> to vector<1x16x128xf32>
    %cst = arith.constant dense<0.000000e+00> : vector<1xf32>
    %5 = vector.multi_reduction <add>, %4, %cst [1, 2] : vector<1x16x128xf32> to vector<1xf32>
    %6 = vector.shape_cast %5 : vector<1xf32> to vector<1x1x1xf32>
    %7 = vector.extract %6[0, 0, 0] : f32 from vector<1x1x1xf32>
    %c0_3 = arith.constant 0 : index
    %c0_4 = arith.constant 0 : index
    %8 = memref.load %arg2[%c0_3, %c0_4] : memref<1x1xf32, #tpu.memory_space<smem>>
    memref.store %7, %arg2[%c0_3, %c0_4] : memref<1x1xf32, #tpu.memory_space<smem>>
    return
  }
}

</mosaic_0001>

<bundles_post_ra>
// kernel: tpu_custom_call.1
= control target key start
LH: loop header
LB: loop body
LE: loop exit
PB: predicated region body
PF: predicated region fallthrough
CT: control target
= control target key end

     0   :  { %7 = vsyncpa [#allocation3], 0  ;;  %s198_s0 = inlined_call_operand.hbm [shape: f32[16,128], index: 0, kind: input, shape index: {}]   ;;  %s199_s1 = inlined_call_operand.hbm [shape: f32[16,128], index: 1, kind: input, shape index: {}]   ;;  %s200_s2 = inlined_call_operand.hbm [shape: f32[1,1], index: 2, kind: output, shape index: {}]  }
   0x1   :  { %8 = vsyncpa [#allocation6], 0 }
   0x2   :  { %9 = vsyncpa [#allocation4], 0  ;;  %s142_s9 = smov [#allocation2]   ;;  %s82_s13 = scalar_lea.hbm %s198_s0, 256 }
   0x3   :  { %s15_s10 = sshll.u32 %s142_s9, 4  ;;  %p83_p0 = scmp.ne.s32.totalorder %s198_s0, %s82_s13  ;;  %s16_s10 = int_to_ptr.vmem [resolvable:$true] %s15_s10 }
   0x4   :  { %p86_p1 = scmp.lt.u32.totalorder %s82_s13, %s198_s0 }
   0x6   :  { %p88_p2 = pnand %p86_p1, %p83_p0 }
   0x8   :  { %91 = shalt.err (!%p88_p2)
}
   0x9   :  { %s92_s18 = scalar_lea.vmem %s16_s10, 256  ;;  %p97_p4 = scmp.lt.s32.totalorder %s16_s10, %s16_s10 }
   0xa   :  { %p93_p3 = scmp.ne.s32.totalorder %s16_s10, %s92_s18  ;;  %p98_p5 = scmp.lt.s32.totalorder %s92_s18, %s92_s18 }
   0xc   :  { %p99_p6 = por %p98_p5, %p97_p4 }
   0xe   :  { %p100_p7 = pnand %p99_p6, %p93_p3 }
  0x10   :  { %103 = shalt.err (!%p100_p7)
}
  0x11   :  { %s143_s19 = smov 128   ;;  %s144_s20 = smov 8  }
  0x12   :  { %21 = dma.hbm_to_vmem [thread:$0]  %s198_s0, 256, %s16_s10, [#allocation3], %s143_s19, %s143_s19, %s144_s20  }
  0x13   :  { %s145_s23 = smov [#allocation5]   ;;  %s104_s27 = scalar_lea.hbm %s199_s1, 256 }
  0x14   :  { %s27_s24 = sshll.u32 %s145_s23, 4  ;;  %p105_p8 = scmp.ne.s32.totalorder %s199_s1, %s104_s27  ;;  %s28_s24 = int_to_ptr.vmem [resolvable:$true] %s27_s24 }
  0x15   :  { %p108_p9 = scmp.lt.u32.totalorder %s104_s27, %s199_s1 }
  0x17   :  { %p110_p10 = pnand %p108_p9, %p105_p8 }
  0x19   :  { %113 = shalt.err (!%p110_p10)
}
  0x1a   :  { %s114_s4 = scalar_lea.vmem %s28_s24, 256  ;;  %p119_p12 = scmp.lt.s32.totalorder %s28_s24, %s28_s24 }
  0x1b   :  { %p115_p11 = scmp.ne.s32.totalorder %s28_s24, %s114_s4  ;;  %p120_p13 = scmp.lt.s32.totalorder %s114_s4, %s114_s4 }
  0x1d   :  { %p121_p0 = por %p120_p13, %p119_p12 }
  0x1f   :  { %p122_p1 = pnand %p121_p0, %p115_p11 }
  0x21   :  { %125 = shalt.err (!%p122_p1)
}
  0x22   :  { %33 = dma.hbm_to_vmem [thread:$0]  %s199_s1, 256, %s28_s24, [#allocation6], %s143_s19, %s143_s19, %s144_s20  }
  0x23   :  { %136 = dma.done.wait [#allocation3], 256  }
  0x24   :  { %137 = vsyncadd [#allocation3], 4294967040 }
  0x25   :  { %138 = dma.done.wait [#allocation6], 256  }
  0x26   :  { %139 = vsyncadd [#allocation6], 4294967040  ;;  %v40_v0 = vld [vmem:[#allocation2] sm:$0xff]  ;;  %v41_v1 = vld [vmem:[#allocation2 + $0x8] sm:$0xff]  ;;  %s126_s8 = scalar_lea.hbm %s200_s2, 16 }
  0x27   :  { %v42_v2 = vld [vmem:[#allocation5] sm:$0xff]  ;;  %v43_v3 = vld [vmem:[#allocation5 + $0x8] sm:$0xff]  ;;  %p127_p2 = scmp.ne.s32.totalorder %s200_s2, %s126_s8  ;;  %p130_p3 = scmp.lt.u32.totalorder %s126_s8, %s200_s2 }
  0x28   :  { %v44_v4 = vsub.f32 %v40_v0, %v42_v2  ;;  %v45_v5 = vsub.f32 %v41_v1, %v43_v3 }
  0x29   :  { %p132_p4 = pnand %p130_p3, %p127_p2 }
  0x2a   :  { %v46_v6 = vmul.f32 %v44_v4, %v44_v4  ;;  %v47_v7 = vmul.f32 %v45_v5, %v45_v5 }
  0x2c   :  { %v48_v8 = vadd.f32 %v47_v7, %v46_v6 }
  0x2e   :  { %49 = vadd.xlane.f32.xlu0 %v48_v8 }
  0xbb   :  { %v50_v9 = vpop.xlane.xlu0 %49 }
  0xbc   :  { %v51_v10 = vrot.slane %v50_v9, 4 }
  0xbe   :  { %v52_v11 = vadd.f32 %v51_v10, %v50_v9 }
  0xc0   :  { %v53_v12 = vrot.slane %v52_v11, 2 }
  0xc2   :  { %v54_v13 = vadd.f32 %v53_v12, %v52_v11 }
  0xc4   :  { %v55_v14 = vrot.slane %v54_v13, 1 }
  0xc6   :  { %v56_v15 = vadd.f32 %v55_v14, %v54_v13 }
  0xc8   :  { %75 = vpush %v56_v15 }
  0xf9   :  { %s76_s1 = spop %75 }
  0xfa   :  { %59 = sst [smem:[#allocation7]] %s76_s1 }
  0xfb   :  { %135 = shalt.err (!%p132_p4)
}
  0xfc   :  { %s146_s13 = smov [#allocation7]  }
  0xfd   :  { %67 = dma.smem_to_hbm %s146_s13, 16, %s200_s2, [#allocation4]  }
  0xfe   :  { %140 = dma.done.wait [#allocation4], 16  }
  0xff   :  { %141 = vsyncadd [#allocation4], 4294967280 }
 0x100   :  { %71 = sfence }
 0x101   :  { %72 = vsyncpa [#allocation3], 1 }
 0x102   :  { %73 = vsyncpa [#allocation6], 1 }
 0x103   :  { %74 = vsyncpa [#allocation4], 1 }

</bundles_post_ra>
